<compile_context>
chip_gen: v5e
topology: v5e:2x2
jax: 0.10.0
libtpu: 0.0.40
codegen_flags: <defaults>
</compile_context>

<pallas_src>
import jax
import jax.numpy as jnp
from jax.experimental import pallas as pl
from jax.experimental.pallas import tpu as pltpu


_MIB = 1024 * 1024


def _physical_vmem_bytes():
    """Per-TensorCore VMEM capacity; conservative fallback if the query fails."""
    try:
        info = pltpu.get_tpu_info()
        v = getattr(info, "vmem_capacity_bytes", None)
        if v:
            return int(v)
    except Exception:
        pass
    return 64 * _MIB  # v7x per-TC VMEM (smallest across generations)


# --------------------------- primary (whole-sample) path ---------------------------
def _single_pass_call(x3, gamma2d, beta2d, nb, vmem_limit):
    n, hw, c = x3.shape

    def kernel(x_ref, gamma_ref, beta_ref, o_ref):
        x = x_ref[...]                                            # (nb, hw, c)
        # Pass-through half of the concat: store immediately (no concat temporary,
        # can overlap with the reduction below).
        o_ref[:, :, :c] = x

        xf = x.astype(jnp.float32)
        # GRN stats: L2 norm over the flattened spatial axis, per (sample, channel).
        gx = jnp.sqrt(jnp.sum(xf * xf, axis=1, keepdims=True))    # (nb, 1, c)
        inv_mean = pl.reciprocal(
            jnp.mean(gx, axis=-1, keepdims=True) + 1e-6, approx=True)  # EUP
        nx = gx * inv_mean                                        # (nb, 1, c)

        gamma = gamma_ref[...].astype(jnp.float32)[None]          # (1, 1, c)
        beta = beta_ref[...].astype(jnp.float32)[None]            # (1, 1, c)
        # y = gamma*(x*nx) + beta + x  ==  x*(1 + gamma*nx) + beta   (f32 apply,
        # single cast at the store).
        y = xf * (1.0 + gamma * nx) + beta
        o_ref[:, :, c:] = y.astype(o_ref.dtype)

    return pl.pallas_call(
        kernel,
        out_shape=jax.ShapeDtypeStruct((n, hw, 2 * c), x3.dtype),
        grid_spec=pltpu.PrefetchScalarGridSpec(
            num_scalar_prefetch=0,
            grid=(n // nb,),
            in_specs=[
                pl.BlockSpec((nb, hw, c), lambda i: (i, 0, 0)),
                pl.BlockSpec((1, c), lambda i: (0, 0)),
                pl.BlockSpec((1, c), lambda i: (0, 0)),
            ],
            out_specs=pl.BlockSpec((nb, hw, 2 * c), lambda i: (i, 0, 0)),
        ),
        compiler_params=pltpu.CompilerParams(
            dimension_semantics=("parallel",),
            vmem_limit_bytes=vmem_limit,
        ),
    )(x3, gamma2d, beta2d)


# ----------------------- fallback: two-phase HW-split path ------------------------
def _hw_split_call(x3, gamma2d, beta2d, thw, vmem_limit):
    """For samples too large for VMEM: grid (N, phase, HW-chunks).

    Phase 0 accumulates the per-channel sum-of-squares into a VMEM scratch;
    phase 1 re-reads each chunk, applies GRN, and stores both concat halves.
    """
    n, hw, c = x3.shape
    chunks = hw // thw

    def kernel(x_ref, gamma_ref, beta_ref, o_ref, ssq_ref):
        p = pl.program_id(1)
        j = pl.program_id(2)

        @pl.when(jnp.logical_and(p == 0, j == 0))
        def _():
            ssq_ref[...] = jnp.zeros_like(ssq_ref)

        x = x_ref[...]                                            # (1, thw, c)
        xf = x.astype(jnp.float32)

        @pl.when(p == 0)
        def _():
            ssq_ref[...] += jnp.sum(xf * xf, axis=1)              # (1, c)

        @pl.when(p == 1)
        def _():
            o_ref[:, :, :c] = x
            gx = jnp.sqrt(ssq_ref[...])                           # (1, c)
            inv_mean = pl.reciprocal(
                jnp.mean(gx, axis=-1, keepdims=True) + 1e-6, approx=True)
            nx = gx * inv_mean
            gamma = gamma_ref[...].astype(jnp.float32)
            beta = beta_ref[...].astype(jnp.float32)
            scale = (1.0 + gamma * nx)[None]                      # (1, 1, c)
            bias = beta[None]                                     # (1, 1, c)
            o_ref[:, :, c:] = (xf * scale + bias).astype(o_ref.dtype)

    return pl.pallas_call(
        kernel,
        out_shape=jax.ShapeDtypeStruct((n, hw, 2 * c), x3.dtype),
        grid_spec=pltpu.PrefetchScalarGridSpec(
            num_scalar_prefetch=0,
            grid=(n, 2, chunks),
            in_specs=[
                pl.BlockSpec((1, thw, c), lambda i, p, j: (i, j, 0)),
                pl.BlockSpec((1, c), lambda i, p, j: (0, 0)),
                pl.BlockSpec((1, c), lambda i, p, j: (0, 0)),
            ],
            # Phase 0 keeps the output block parked at chunk 0 (never written there);
            # phase 1 writes chunk j, which is flushed when the block index advances.
            out_specs=pl.BlockSpec((1, thw, 2 * c), lambda i, p, j: (i, p * j, 0)),
            scratch_shapes=[pltpu.VMEM((1, c), jnp.float32)],
        ),
        compiler_params=pltpu.CompilerParams(
            dimension_semantics=("parallel", "arbitrary", "arbitrary"),
            vmem_limit_bytes=vmem_limit,
        ),
    )(x3, gamma2d, beta2d)


# ----------------------------------- wrapper ---------------------------------------
def concat_grn(x, gamma, beta, *, vmem_budget_bytes=None):
    """ConcatBlock(sub=GRN) forward.

    x: (N, H, W, C) channels-last; gamma, beta: (1, 1, 1, C) (PyTorch param shape).
    Returns (N, H, W, 2C): channels [:C] = x, channels [C:] = GRN(x).
    """
    n, h, w, c = x.shape
    hw = h * w
    x3 = x.reshape(n, hw, c)
    gamma2d = gamma.reshape(1, c).astype(jnp.float32)
    beta2d = beta.reshape(1, c).astype(jnp.float32)

    itemsize = jnp.dtype(x.dtype).itemsize
    phys = _physical_vmem_bytes()
    cap = phys * 3 // 4            # <= 48 MiB on v7x, <= 96 MiB on v5e/v6e
    budget = vmem_budget_bytes if vmem_budget_bytes is not None else cap // 2

    # Honest per-sample footprint: double-buffered input (2x) + double-buffered
    # 2C-wide output (4x) + f32 temporaries for reduction/apply (~2 f32 blocks).
    per_sample_block = hw * c * itemsize
    per_sample_need = 6 * per_sample_block + 2 * hw * c * 4

    # Samples per block: largest divisor of N that fits the budget while keeping
    # >= 4 grid steps (>= 2 per TC on v7x megacore, >= 3 on single-TC chips) when N
    # allows it.
    target_steps = 4
    nb = None
    for d in range(1, n + 1):
        if n % d:
            continue
        if d * per_sample_need > budget:
            continue
        if (n // d) < min(n, target_steps):
            continue
        nb = d

    if nb is not None:
        need = nb * per_sample_need
        vmem_limit = int(min(cap, max(need * 5 // 4, 16 * _MIB)))
        out3 = _single_pass_call(x3, gamma2d, beta2d, nb, vmem_limit)
    else:
        # Even a single sample is too big: split over HW (two-phase, re-reads x once).
        def chunk_need(t):
            return 6 * t * c * itemsize + 2 * t * c * 4

        thw = None
        for d in range(8, hw + 1, 8):        # chunk must be a multiple of 8 sublanes
            if hw % d:
                continue
            if chunk_need(d) <= budget:
                thw = d
        if thw is None:
            thw = 8 if hw % 8 == 0 else hw   # smallest legal chunk as last resort
        need = chunk_need(thw)
        vmem_limit = int(min(cap, max(need * 5 // 4, 16 * _MIB)))
        out3 = _hw_split_call(x3, gamma2d, beta2d, thw, vmem_limit)

    return out3.reshape(n, h, w, 2 * c)


# ----------------------------- pure-JAX reference -----------------------------
def grn_reference(x, gamma, beta):
    """GRN forward mirroring the PyTorch module exactly (all f32)."""
    xf = x.astype(jnp.float32)
    gx = jnp.sqrt(jnp.sum(xf * xf, axis=(1, 2), keepdims=True))
    nx = gx / (jnp.mean(gx, axis=-1, keepdims=True) + 1e-6)
    return (gamma * (xf * nx) + beta + xf).astype(x.dtype)


def concat_block_reference(x, gamma, beta):
    """ConcatBlock(sub=GRN): cat([x, sub(x)]) along the channel (last, NHWC) axis."""
    return jnp.concatenate([x, grn_reference(x, gamma, beta)], axis=-1)


if __name__ == "__main__":
    # C=128 keeps both concat halves and the 2C output lane-dense (multiples of 128);
    # N=4 gives >= 4 grid steps for megacore + pipeline depth.
    N, H, W, C = 4, 8, 8, 128
    key = jax.random.PRNGKey(0)
    kx, kg, kb = jax.random.split(key, 3)

    x = jax.random.normal(kx, (N, H, W, C), dtype=jnp.float32)
    gamma = 0.1 * jax.random.normal(kg, (1, 1, 1, C), dtype=jnp.float32)
    beta = 0.1 * jax.random.normal(kb, (1, 1, 1, C), dtype=jnp.float32)

    ref = concat_block_reference(x, gamma, beta)

    # --- primary (whole-sample) path ---
    out = jax.block_until_ready(concat_grn(x, gamma, beta))
    assert out.shape == (N, H, W, 2 * C)
    assert jnp.array_equal(out[..., :C], x), "concat passthrough mismatch"
    assert jnp.allclose(out[..., C:], ref[..., C:], atol=5e-3, rtol=5e-3), \
        "GRN half mismatch vs reference (primary path)"

    # Exact init (gamma = beta = 0): GRN half must reduce to identity.
    zeros = jnp.zeros((1, 1, 1, C), dtype=jnp.float32)
    out0 = jax.block_until_ready(concat_grn(x, zeros, zeros))
    assert jnp.allclose(out0[..., :C], x, atol=1e-6)
    assert jnp.allclose(out0[..., C:], x, atol=1e-6)

    # --- fallback (two-phase HW-split) path, forced via a tiny VMEM budget ---
    out_split = jax.block_until_ready(
        concat_grn(x, gamma, beta, vmem_budget_bytes=200 * 1024))
    assert out_split.shape == (N, H, W, 2 * C)
    assert jnp.array_equal(out_split[..., :C], x), "passthrough mismatch (split path)"
    assert jnp.allclose(out_split[..., C:], ref[..., C:], atol=5e-3, rtol=5e-3), \
        "GRN half mismatch vs reference (split path)"

    print("KERNEL_OK")
</pallas_src>

<mosaic_0001>
module attributes {stable_mosaic.version = 11 : i64} {
  func.func @kernel(%arg0: i32, %arg1: memref<1x64x128xf32, #tpu.memory_space<vmem>>, %arg2: memref<1x128xf32, #tpu.memory_space<vmem>>, %arg3: memref<1x128xf32, #tpu.memory_space<vmem>>, %arg4: memref<1x64x256xf32, #tpu.memory_space<vmem>>) attributes {dimension_semantics = [#tpu.dimension_semantics<parallel>], iteration_bounds = array<i64: 4>, scalar_prefetch = 0 : i64, scratch_operands = 0 : i64, tpu.core_type = #tpu.core_type<tc>, window_params = [{transform_indices = @transform_0, window_bounds = array<i64: 1, 64, 128>}, {pipeline_mode = #tpu.pipeline_mode<synchronous>, transform_indices = @transform_1, window_bounds = array<i64: 1, 128>}, {pipeline_mode = #tpu.pipeline_mode<synchronous>, transform_indices = @transform_2, window_bounds = array<i64: 1, 128>}, {transform_indices = @transform_3, window_bounds = array<i64: 1, 64, 256>}]} {
    %c0 = arith.constant 0 : index
    %c0_0 = arith.constant 0 : index
    %c0_1 = arith.constant 0 : index
    %0 = vector.load %arg1[%c0, %c0_0, %c0_1] : memref<1x64x128xf32, #tpu.memory_space<vmem>>, vector<1x64x128xf32>
    %c0_2 = arith.constant 0 : index
    %c0_3 = arith.constant 0 : index
    %c0_4 = arith.constant 0 : index
    %1 = vector.load %arg4[%c0_2, %c0_3, %c0_4] : memref<1x64x256xf32, #tpu.memory_space<vmem>>, vector<1x64x128xf32>
    tpu.vector_store %arg4[%c0_2, %c0_3, %c0_4], %0 {strides = array<i32>} : memref<1x64x256xf32, #tpu.memory_space<vmem>>, vector<1x64x128xf32>,
    %2 = arith.mulf %0, %0 : vector<1x64x128xf32>
    %cst = arith.constant dense<0.000000e+00> : vector<1x128xf32>
    %3 = vector.multi_reduction <add>, %2, %cst [1] : vector<1x64x128xf32> to vector<1x128xf32>
    %4 = vector.shape_cast %3 : vector<1x128xf32> to vector<1x1x128xf32>
    %5 = math.sqrt %4 : vector<1x1x128xf32>
    %cst_5 = arith.constant dense<0.000000e+00> : vector<1x1xf32>
    %6 = vector.multi_reduction <add>, %5, %cst_5 [2] : vector<1x1x128xf32> to vector<1x1xf32>
    %7 = vector.shape_cast %6 : vector<1x1xf32> to vector<1x1x1xf32>
    %cst_6 = arith.constant 1.280000e+02 : f32
    %8 = vector.broadcast %cst_6 : f32 to vector<1x1x1xf32>
    %9 = arith.divf %7, %8 : vector<1x1x1xf32>
    %cst_7 = arith.constant 9.99999997E-7 : f32
    %10 = vector.broadcast %cst_7 : f32 to vector<1x1x1xf32>
    %11 = arith.addf %9, %10 : vector<1x1x1xf32>
    %12 = tpu.reciprocal %11 {approx = true} : vector<1x1x1xf32> -> vector<1x1x1xf32>
    %13 = vector.broadcast %12 : vector<1x1x1xf32> to vector<1x1x128xf32>
    %14 = arith.mulf %5, %13 : vector<1x1x128xf32>
    %c0_8 = arith.constant 0 : index
    %c0_9 = arith.constant 0 : index
    %15 = vector.load %arg2[%c0_8, %c0_9] : memref<1x128xf32, #tpu.memory_space<vmem>>, vector<1x128xf32>
    %16 = vector.shape_cast %15 : vector<1x128xf32> to vector<1x1x128xf32>
    %c0_10 = arith.constant 0 : index
    %c0_11 = arith.constant 0 : index
    %17 = vector.load %arg3[%c0_10, %c0_11] : memref<1x128xf32, #tpu.memory_space<vmem>>, vector<1x128xf32>
    %18 = vector.shape_cast %17 : vector<1x128xf32> to vector<1x1x128xf32>
    %19 = arith.mulf %16, %14 : vector<1x1x128xf32>
    %cst_12 = arith.constant 1.000000e+00 : f32
    %20 = vector.broadcast %cst_12 : f32 to vector<1x1x128xf32>
    %21 = arith.addf %20, %19 : vector<1x1x128xf32>
    %22 = vector.broadcast %21 : vector<1x1x128xf32> to vector<1x64x128xf32>
    %23 = arith.mulf %0, %22 : vector<1x64x128xf32>
    %24 = vector.broadcast %18 : vector<1x1x128xf32> to vector<1x64x128xf32>
    %25 = arith.addf %23, %24 : vector<1x64x128xf32>
    %c0_13 = arith.constant 0 : index
    %c0_14 = arith.constant 0 : index
    %c128 = arith.constant 128 : index
    %26 = vector.load %arg4[%c0_13, %c0_14, %c128] : memref<1x64x256xf32, #tpu.memory_space<vmem>>, vector<1x64x128xf32>
    tpu.vector_store %arg4[%c0_13, %c0_14, %c128], %25 {strides = array<i32>} : memref<1x64x256xf32, #tpu.memory_space<vmem>>, vector<1x64x128xf32>,
    return
  }
  func.func @transform_0(%arg0: i32) -> (i32, i32, i32) {
    %c0_i32 = arith.constant 0 : i32
    %c0_i32_0 = arith.constant 0 : i32
    %c0_i32_1 = arith.constant 0 : i32
    return %arg0, %c0_i32, %c0_i32_0 : i32, i32, i32
  }
  func.func @transform_1(%arg0: i32) -> (i32, i32) {
    %c0_i32 = arith.constant 0 : i32
    %c0_i32_0 = arith.constant 0 : i32
    %c0_i32_1 = arith.constant 0 : i32
    return %c0_i32, %c0_i32_0 : i32, i32
  }
  func.func @transform_2(%arg0: i32) -> (i32, i32) {
    %c0_i32 = arith.constant 0 : i32
    %c0_i32_0 = arith.constant 0 : i32
    %c0_i32_1 = arith.constant 0 : i32
    return %c0_i32, %c0_i32_0 : i32, i32
  }
  func.func @transform_3(%arg0: i32) -> (i32, i32, i32) {
    %c0_i32 = arith.constant 0 : i32
    %c0_i32_0 = arith.constant 0 : i32
    %c0_i32_1 = arith.constant 0 : i32
    return %arg0, %c0_i32, %c0_i32_0 : i32, i32, i32
  }
}

</mosaic_0001>

<bundles_post_ra>
// kernel: tpu_custom_call.1
= control target key start
LH: loop header
LB: loop body
LE: loop exit
PB: predicated region body
PF: predicated region fallthrough
CT: control target
= control target key end

     0   :  { %8 = vsyncpa [#allocation3], 0  ;;  %s851_s0 = inlined_call_operand.hbm [shape: f32[4,64,128], index: 0, kind: input, shape index: {}]   ;;  %s852_s1 = inlined_call_operand.hbm [shape: f32[1,128], index: 1, kind: input, shape index: {}]   ;;  %s853_s2 = inlined_call_operand.vmem [shape: f32[1,128], index: 2, kind: input, shape index: {}]   ;;  %s854_s3 = inlined_call_operand.hbm [shape: f32[4,64,256], index: 3, kind: output, shape index: {}]  }
   0x1   :  { %10 = vsyncpa [#allocation3 + $0x1], 0 }
   0x2   :  { %11 = vsyncpa [#allocation6], 0 }
   0x3   :  { %12 = vsyncpa [#allocation4], 0 }
   0x4   :  { %14 = vsyncpa [#allocation4 + $0x1], 0  ;;  %s646_s12 = smov 0   ;;  %s648_s13 = smov 0  }
   0x5   :  { %s650_s14 = smov 0   ;;  %s652_s15 = smov 0  }
   0x6 LB: > { %s667_s16 = sadd.s32 4294967295, %s618_s15   ;;  %s401_s17 = sadd.s32 4294967294, %s618_s15   ;;  %s618_s15 = sphi %s652_s15, %s864_s15   ;;  %s614_s14 = sphi %s650_s14, %s863_s14   ;;  %s610_s13 = sphi %s648_s13, %s862_s13   ;;  %s606_s12 = sphi %s646_s12, %s861_s12  }
   0x7   : > { %s671_s18 = sadd.s32 1, %s618_s15   ;;  %s27_s19 = sadd.s32 1, %s614_s14 }
   0x8   : > { %s24_s20 = ssub.s32 %s618_s15, %s671_s18  ;;  %p34_p0 = scmp.ne.s32.totalorder %s614_s14, %s610_s13 }
   0x9   : > { %p25_p1 = scmp.eq.s32.totalorder %s24_s20, 0  ;;  %p35_p2 = scmp.eq.s32.totalorder %s618_s15, 0 }
   0xa   : > { %p40_p3 = scmp.ne.s32.totalorder %s610_s13, %s606_s12  ;;  %p41_p4 = scmp.eq.s32.totalorder %s667_s16, 0 }
   0xb   : > { %s683_s21 = scalar_select %p25_p1, %s614_s14, %s27_s19  }
   0xc   : > { %p685_p5 = por %p35_p2, %p34_p0  ;;  %p691_p6 = por %p41_p4, %p40_p3 }
   0xd   : > { %p106_p7 = scmp.eq.s32.totalorder %s667_s16, 3  ;;  %p112_p8 = scmp.eq.s32.totalorder %s401_s17, 3 }
   0xe   : > { %p402_p9 = scmp.ge.s32.totalorder %s618_s15, 1  ;;  %p119_p10 = scmp.lt.s32.totalorder %s618_s15, 5 }
   0xf   : > { %p698_p11 = por %p106_p7, %p34_p0  ;;  %p702_p12 = por %p112_p8, %p40_p3 }
  0x10   : > { %p706_p13 = pnand %p402_p9, %p119_p10  ;;  %s131_s29 = sshll.u32 %s852_s1, 4  ;;  %s132_s29 = int_to_ptr.hbm [resolvable:$true] %s131_s29 }
  0x11   : > { %s620_s30 = smov [#allocation5]   ;;  %p440_p2 = scmp.lt.s32.totalorder %s618_s15, 4 }
  0x12   : > { %p427_p1 = pneg %p706_p13  ;;  %s133_s4 = sshll.u32 %s620_s30, 4  ;;  %s134_s4 = int_to_ptr.vmem [resolvable:$true] %s133_s4 }
  0x13   : > { %s147_s5 = sand.u32 1, %s614_s14   ;;  %p721_p3 = pnand %p440_p2, %p685_p5 }
  0x14   : > { %p428_p0 = pnand %p427_p1, %p41_p4  ;;  %s405_s7 = sshll.u32 %s147_s5, 6 }
  0x15   : > { %s417_s8 = sshll.u32 %s618_s15, 6  ;;  %s151_s19 = scalar_lea.vmem [#allocation2], %s405_s7 }
  0x16   : > { %430 = dma.hbm_to_vmem [thread:$0]  (!%p428_p0), %s132_s29, 16, %s134_s4, [#allocation6]  }
  0x17   : > { %s156_s11 = scalar_lea.hbm %s851_s0, %s417_s8  ;;  %s159_s20 = sshll.u32 %s151_s19, 4  ;;  %s160_s20 = int_to_ptr.vmem [resolvable:$true] %s159_s20 }
  0x18   : > { %s157_s17 = sshll.u32 %s156_s11, 4  ;;  %s148_s27 = scalar_lea.sflag [#allocation3], %s147_s5  ;;  %s158_s17 = int_to_ptr.hbm [resolvable:$true] %s157_s17 }
  0x19   : > { %s518_s28 = sshra.s32 %s158_s17, 4  ;;  %p522_p7 = pneg %p721_p3  ;;  %s519_s28 = int_to_ptr.hbm [resolvable:$true] %s518_s28 }
  0x1a   : > { %s520_s22 = scalar_lea.hbm %s519_s28, 64  ;;  %s525_s4 = scalar_lea.hbm %s851_s0, 256 }
  0x1b   : > { %p521_p5 = scmp.ne.s32.totalorder %s519_s28, %s520_s22  ;;  %p526_p10 = scmp.lt.s32.totalorder %s519_s28, %s851_s0 }
  0x1c   : > { %p527_p1 = scmp.lt.s32.totalorder %s525_s4, %s520_s22 }
  0x1d   : > { %p523_p8 = pnand %p522_p7, %p521_p5 }
  0x1e   : > { %p528_p0 = por %p527_p1, %p526_p10 }
  0x1f   : > { %p524_p9 = pneg %p523_p8 }
  0x21   : > { %p529_p2 = pnand %p528_p0, %p524_p9 }
  0x23   : > { %532 = shalt.err (!%p529_p2)
}
  0x24   : > { %s621_s5 = smov 128   ;;  %s622_s7 = smov 8  }
  0x25   : > { %434 = dma.hbm_to_vmem [thread:$0]  (!%p721_p3), %s158_s17, 1024, %s160_s20, %s148_s27, %s621_s5, %s621_s5, %s622_s7  }
  0x26   : > { %171 = sbr.rel (%p706_p13) target bundleno = 246 (0xf6), region = 32  ;;  %s742_s10 = sand.u32 (!%p706_p13), 1, %s610_s13  }
  0x27   : > { %s409_s11 = sshll.u32 (!%p706_p13), %s742_s10, 6  ;;  %s174_s19 = scalar_lea.sflag (!%p706_p13), [#allocation3], %s742_s10 }
  0x28   : > { %s177_s28 = scalar_lea.vmem (!%p706_p13), [#allocation2], %s409_s11 }
  0x2b   : > { %593 = dma.done.wait (%p691_p6), %s174_s19, 1024  }
  0x2c   : > { %595 = vsyncadd (%p691_p6), %s174_s19, 4294966272 }
  0x2d   : > { %597 = dma.done.wait (%p41_p4), [#allocation6], 16  }
  0x2e   : > { %599 = vsyncadd (%p41_p4), [#allocation6], 4294967280  ;;  %s411_s26 = sshll.u32 %s742_s10, 7  ;;  %v755_v0 = vld [vmem:[%s177_s28] sm:$0xff]  ;;  %v757_v1 = vld [vmem:[%s177_s28 + $0x8] sm:$0xff]  ;;  %v623_v39 = vmov 128.0  }
  0x2f   : > { %v759_v2 = vld [vmem:[%s177_s28 + $0x10] sm:$0xff]  ;;  %v761_v3 = vld [vmem:[%s177_s28 + $0x18] sm:$0xff]  ;;  %s763_s6 = scalar_lea.vmem [#allocation7], %s411_s26  ;;  %v222_v4 = vmul.f32 %v755_v0, %v755_v0  ;;  %v223_v5 = vmul.f32 %v757_v1, %v757_v1  ;;  %v773_v7 = vld [vmem:[%s177_s28 + $0x20] sm:$0xff]  ;;  %s418_s20 = sshll.u32 %s667_s16, 7 }
  0x30   : > { %214 = vst [vmem:[%s763_s6] sm:$0xff] %v755_v0  ;;  %v224_v6 = vmul.f32 %v759_v2, %v759_v2  ;;  %v225_v8 = vmul.f32 %v761_v3, %v761_v3  ;;  %v781_v10 = vld [vmem:[%s177_s28 + $0x28] sm:$0xff]  ;;  %v226_v11 = vmul.f32 %v773_v7, %v773_v7  ;;  %v212_v13 = vld [vmem:[%s177_s28 + $0x30] sm:$0xff]  ;;  %v791_v14 = vld [vmem:[%s177_s28 + $0x38] sm:$0xff]  ;;  %s314_s22 = scalar_lea.hbm %s854_s3, %s418_s20  ;;  %s315_s29 = sshll.u32 %s763_s6, 4  ;;  %s316_s29 = int_to_ptr.vmem [resolvable:$true] %s315_s29 }
  0x31   : > { %215 = vst [vmem:[%s763_s6 + $0x10] sm:$0xff] %v757_v1  ;;  %v230_v9 = vadd.f32 %v223_v5, %v222_v4  ;;  %v227_v15 = vmul.f32 %v781_v10, %v781_v10  ;;  %v228_v17 = vmul.f32 %v212_v13, %v212_v13  ;;  %v229_v19 = vmul.f32 %v791_v14, %v791_v14  ;;  %v268_v50 = vld [vmem:[#allocation5] sm:$0x1]  ;;  %s317_s30 = sshll.u32 %s314_s22, 4  ;;  %s303_s4 = scalar_lea.sflag [#allocation4], %s742_s10  ;;  %s318_s30 = int_to_ptr.hbm [resolvable:$true] %s317_s30 }
  0x32   : > { %216 = vst [vmem:[%s763_s6 + $0x20] sm:$0xff] %v759_v2  ;;  %v481_v55 = vld [vmem:[%s853_s2] ss:$0 sm:$0xff]  ;;  %s562_s9 = sshra.s32 %s318_s30, 4  ;;  %s568_s11 = scalar_lea.hbm %s854_s3, 512  ;;  %s563_s9 = int_to_ptr.hbm [resolvable:$true] %s562_s9 }
  0x33   : > { %217 = vst [vmem:[%s763_s6 + $0x30] sm:$0xff] %v761_v3  ;;  %v231_v12 = vadd.f32 %v230_v9, %v224_v6  ;;  %s564_s8 = scalar_lea.hbm %s563_s9, 128  ;;  %p569_p3 = scmp.lt.s32.totalorder %s563_s9, %s854_s3 }
  0x34   : > { %218 = vst [vmem:[%s763_s6 + $0x40] sm:$0xff] %v773_v7  ;;  %p565_p4 = scmp.ne.s32.totalorder %s563_s9, %s564_s8  ;;  %p570_p5 = scmp.lt.s32.totalorder %s568_s11, %s564_s8 }
  0x35   : > { %219 = vst [vmem:[%s763_s6 + $0x50] sm:$0xff] %v781_v10  ;;  %v232_v16 = vadd.f32 %v231_v12, %v225_v8 }
  0x36   : > { %220 = vst [vmem:[%s763_s6 + $0x60] sm:$0xff] %v212_v13  ;;  %p566_p6 = pnand %p565_p4, %p698_p11  ;;  %p571_p7 = por %p570_p5, %p569_p3 }
  0x37   : > { %221 = vst [vmem:[%s763_s6 + $0x70] sm:$0xff] %v791_v14  ;;  %v233_v18 = vadd.f32 %v232_v16, %v226_v11 }
  0x38   : > { %p567_p13 = pneg %p566_p6 }
  0x39   : > { %v234_v20 = vadd.f32 %v233_v18, %v227_v15 }
  0x3a   : > { %p572_p8 = pnand %p571_p7, %p567_p13 }
  0x3b   : > { %v235_v21 = vadd.f32 %v234_v20, %v228_v17 }
  0x3d   : > { %v236_v22 = vadd.f32 %v235_v21, %v229_v19 }
  0x3f   : > { %v237_v23 = vrot.slane %v236_v22, 4 }
  0x41   : > { %v238_v24 = vadd.f32 %v237_v23, %v236_v22 }
  0x43   : > { %v239_v25 = vrot.slane %v238_v24, 2 }
  0x45   : > { %v240_v26 = vadd.f32 %v239_v25, %v238_v24 }
  0x47   : > { %v241_v27 = vrot.slane %v240_v26, 1 }
  0x49   : > { %v242_v28 = vadd.f32 %v241_v27, %v240_v26 }
  0x4b   : > { %482 = vrsqrt.f32 %v242_v28  ;;  %vm250_vm0 = vcmp.eq.f32.partialorder %v242_v28, inf  ;;  %v253_v35 = vand.u32 2147483648, %v242_v28  ;;  %vm252_vm1 = vcmp.eq.f32.partialorder %v242_v28, 0.0 }
  0x4c   : > { %484 = vrcp.f32 %v623_v39 }
  0x51   : > { %v483_v29 = vpop.eup %482 }
  0x52   : > { %v244_v30 = vmul.f32 %v483_v29, %v242_v28  ;;  %v485_v40 = vpop.eup %484 }
  0x53   : > { %v258_v41 = vmul.f32 128.0, %v485_v40  ;;  %vm262_vm2 = vweird.f32 %v485_v40 }
  0x54   : > { %v245_v31 = vmul.f32 %v483_v29, %v244_v30 }
  0x55   : > { %v259_v42 = vsub.f32 1.0, %v258_v41 }
  0x56   : > { %v246_v32 = vmul.f32 0.5, %v245_v31 }
  0x57   : > { %v260_v43 = vmul.f32 %v485_v40, %v259_v42 }
  0x58   : > { %v247_v33 = vsub.f32 1.5, %v246_v32 }
  0x59   : > { %v261_v44 = vadd.f32 %v485_v40, %v260_v43 }
  0x5a   : > { %v248_v34 = vmul.f32 %v483_v29, %v247_v33 }
  0x5b   : > { %v263_v45 = vsel %vm262_vm2, %v485_v40, %v261_v44 }
  0x5c   : > { %v249_v36 = vmul.f32 %v248_v34, %v242_v28 }
  0x5e   : > { %v251_v37 = vsel %vm250_vm0, %v242_v28, %v249_v36 }
  0x5f   : > { %v254_v38 = vsel %vm252_vm1, %v253_v35, %v251_v37 }
  0x60   : > { %255 = vadd.xlane.f32.xlu0 %v254_v38 }
  0xd3   : > { %v256_v46 = vpop.xlane.xlu0 %255 }
  0xd4   : > { %v264_v47 = vmul.f32 %v263_v45, %v256_v46 }
  0xd6   : > { %v265_v48 = vadd.f32 1e-06, %v264_v47 }
  0xd8   : > { %486 = vrcp.f32 %v265_v48 }
  0xde   : > { %v487_v49 = vpop.eup %486 }
  0xdf   : > { %v267_v51 = vmul.f32 %v487_v49, %v254_v38 }
  0xe1   : > { %v270_v52 = vmul.f32 %v268_v50, %v267_v51 }
  0xe3   : > { %v271_v53 = vadd.f32 1.0, %v270_v52 }
  0xe5   : > { %v273_v54 = vperm.slane %v271_v53, 0 }
  0xe7   : > { %v275_v56 = vmul.f32 %v273_v54, %v755_v0  ;;  %v276_v57 = vmul.f32 %v273_v54, %v757_v1  ;;  %v277_v58 = vmul.f32 %v273_v54, %v759_v2  ;;  %v278_v59 = vmul.f32 %v273_v54, %v761_v3 }
  0xe8   : > { %v279_v60 = vmul.f32 %v273_v54, %v773_v7  ;;  %v280_v61 = vmul.f32 %v273_v54, %v781_v10  ;;  %v281_v62 = vmul.f32 %v273_v54, %v212_v13  ;;  %v282_v0 = vmul.f32 %v273_v54, %v791_v14 }
  0xe9   : > { %v286_v63 = vadd.f32 %v481_v55, %v275_v56  ;;  %v287_v4 = vadd.f32 %v481_v55, %v276_v57  ;;  %v288_v5 = vadd.f32 %v481_v55, %v277_v58  ;;  %v289_v1 = vadd.f32 %v481_v55, %v278_v59 }
  0xea   : > { %v290_v2 = vadd.f32 %v481_v55, %v279_v60  ;;  %v291_v3 = vadd.f32 %v481_v55, %v280_v61  ;;  %v292_v6 = vadd.f32 %v481_v55, %v281_v62  ;;  %v293_v7 = vadd.f32 %v481_v55, %v282_v0 }
  0xeb   : > { %294 = vst [vmem:[%s763_s6 + $0x8] sm:$0xff] %v286_v63 }
  0xec   : > { %295 = vst [vmem:[%s763_s6 + $0x18] sm:$0xff] %v287_v4 }
  0xed   : > { %296 = vst [vmem:[%s763_s6 + $0x28] sm:$0xff] %v288_v5 }
  0xee   : > { %297 = vst [vmem:[%s763_s6 + $0x38] sm:$0xff] %v289_v1 }
  0xef   : > { %298 = vst [vmem:[%s763_s6 + $0x48] sm:$0xff] %v290_v2 }
  0xf0   : > { %299 = vst [vmem:[%s763_s6 + $0x58] sm:$0xff] %v291_v3 }
  0xf1   : > { %300 = vst [vmem:[%s763_s6 + $0x68] sm:$0xff] %v292_v6 }
  0xf2   : > { %301 = vst [vmem:[%s763_s6 + $0x78] sm:$0xff] %v293_v7 }
  0xf3   : > { %575 = shalt.err (!%p572_p8)
}
  0xf4   : > { %s624_s10 = smov 256   ;;  %s625_s26 = smov 16  }
  0xf5   : > { %425 = dma.vmem_to_hbm [thread:$0]  (%p698_p11), %s316_s29, 2048, %s318_s30, %s303_s4, %s624_s10, %s624_s10, %s625_s26  }
  0xf6 PF: > { %p442_p9 = scmp.ge.s32.totalorder %s618_s15, 2  ;;  %s332_s6 = sand.u32 1, %s606_s12  }
  0xf7   : > { %s333_s23 = scalar_lea.sflag [#allocation4], %s332_s6 }
  0xf8   : > { %p436_p10 = pnand %p442_p9, %p702_p12 }
  0xfa   : > { %p437_p1 = pneg %p436_p10 }
  0xfc   : > { %601 = dma.done.wait (%p437_p1), %s333_s23, 2048  }
  0xfd   : > { %603 = vsyncadd (%p437_p1), %s333_s23, 4294965248  ;;  %p17_p0 = scmp.ge.s32.totalorder %s671_s18, 6   ;;  %s861_s12 = smov %s610_s13 }
  0xfe   : > { %s862_s13 = smov %s614_s14  ;;  %s863_s14 = smov %s683_s21 }
  0xff   : > { %s864_s15 = smov %s671_s18  ;;  %19 = sbr.rel (!%p17_p0) target bundleno = 6 (0x6), region = 81 }
 0x104   :  { %339 = vsyncpa [#allocation3], 1 }
 0x105   :  { %341 = vsyncpa [#allocation3 + $0x1], 1 }
 0x106   :  { %342 = vsyncpa [#allocation6], 1 }
 0x107   :  { %343 = vsyncpa [#allocation4], 1 }
 0x108   :  { %345 = vsyncpa [#allocation4 + $0x1], 1 }

</bundles_post_ra>
